<compile_context>
chip_gen: v5e
topology: v5e:2x2
jax: 0.10.0
libtpu: 0.0.40
codegen_flags: <defaults>
</compile_context>

<pallas_src>
import functools

import numpy as np
import jax
import jax.numpy as jnp
from jax.experimental import pallas as pl
from jax.experimental.pallas import tpu as pltpu


# ---------------------------------------------------------------------------
# Kernel: BB batch elements per grid step.
#   y_ref  : (BB, K, HWp) f32   input heatmap (spatial flattened, lane-padded)
#   hw_ref : (2,  HWp)    f32   row / col index of each flattened spatial pos
#   gt_ref : (BB, K, HWp)       ground_truth
#   gf_ref : (BB, K, HWp)       ground_false
# ---------------------------------------------------------------------------
def _fast_pseudo_label_kernel(y_ref, hw_ref, gt_ref, gf_ref, *,
                              width, inv_two_sigma_sq):
    y = y_ref[...]                                           # (BB, K, HWp)
    bb, num_k, hwp = y.shape
    width_f = float(width)

    # Per-(batch, keypoint) argmax over the flattened spatial axis
    # (first occurrence, matches numpy tie-breaking).  f32 indices are exact
    # since HWp < 2^20 (asserted in wrapper).
    maxv = jnp.max(y, axis=-1, keepdims=True)                # (BB, K, 1)
    col = jax.lax.broadcasted_iota(jnp.int32, (bb, num_k, hwp), 2).astype(jnp.float32)
    cand = jnp.where(y == maxv, col, float(hwp))
    flat = jnp.min(cand, axis=-1, keepdims=True)             # (BB, K, 1)

    # Decompose flat -> (pred_h, pred_w) directly on the tiny (BB, K, 1) tile.
    # The +0.5 keeps the true quotient away from integer boundaries; the
    # correction step makes the decomposition exact even if the divide is off
    # by an ulp.
    pred_h = jnp.floor((flat + 0.5) / width_f)
    pred_w = flat - pred_h * width_f
    pred_h = (pred_h
              + jnp.where(pred_w >= width_f, 1.0, 0.0)
              - jnp.where(pred_w < 0.0, 1.0, 0.0))
    pred_w = flat - pred_h * width_f

    # Analytic Gaussian + F.threshold(·, 0.01, 0.0).
    hw = hw_ref[...]                                         # (2, HWp)
    h_f = hw[0:1].reshape(1, 1, hwp)                         # (1, 1, HWp)
    w_f = hw[1:2].reshape(1, 1, hwp)
    dh = h_f - pred_h                                        # (BB, K, HWp)
    dw = w_f - pred_w
    gauss = jnp.exp(-(dh * dh + dw * dw) * inv_two_sigma_sq)
    gt = jnp.where(gauss > 0.01, gauss, 0.0)

    # ground_false = clip(sum over keypoints - gt, 0, 1): sublane reduce + VPU.
    gf = jnp.clip(jnp.sum(gt, axis=1, keepdims=True) - gt, 0.0, 1.0)

    gt_ref[...] = gt.astype(gt_ref.dtype)
    gf_ref[...] = gf.astype(gf_ref.dtype)


def _pick_block_batch(B, K, HWp, out_itemsize,
                      budget_bytes=12 * 1024 * 1024):
    """Largest BB such that double-buffered in+2out blocks fit the VMEM budget,
    the grid has >= 2 steps (v7x megacore), and BB divides B."""
    per_b = 2 * K * HWp * (4 + 2 * out_itemsize)     # 2 buffers x (in + 2 outs)
    bb = max(1, budget_bytes // per_b)
    if B >= 2:
        bb = min(bb, B // 2)                         # keep >= 2 grid steps
    bb = max(1, min(bb, B))
    while B % bb:
        bb -= 1
    return bb


# ---------------------------------------------------------------------------
# Wrapper
# ---------------------------------------------------------------------------
def fast_pseudo_label_generator_2d(heatmap, sigma=2.0, out_dtype=jnp.float32):
    B, K, H, W = heatmap.shape
    HW = H * W
    assert HW <= (1 << 20), (
        "spatial size too large for the exact f32 argmax/index decomposition")

    LANE = 128
    HWp = ((HW + LANE - 1) // LANE) * LANE

    # heatmap.detach() in the PyTorch module is a no-op here (no grad tracking).
    y2 = heatmap.reshape(B, K, HW).astype(jnp.float32)       # lane-dense view
    if HWp != HW:
        y2 = jnp.pad(y2, ((0, 0), (0, 0), (0, HWp - HW)),
                     constant_values=float(np.finfo(np.float32).min))

    # Single (2, HWp) constant coordinate map for the flattened spatial axis.
    hw_iota = np.arange(HWp, dtype=np.int64)
    coords = jnp.asarray(np.stack([(hw_iota // W).astype(np.float32),
                                   (hw_iota % W).astype(np.float32)], axis=0))

    out_itemsize = jnp.dtype(out_dtype).itemsize
    BB = _pick_block_batch(B, K, HWp, out_itemsize)
    grid = (B // BB,)

    kernel = functools.partial(
        _fast_pseudo_label_kernel,
        width=W,
        inv_two_sigma_sq=1.0 / (2.0 * float(sigma) * float(sigma)))

    cost = pl.CostEstimate(
        flops=int(10 * B * K * HWp),
        transcendentals=int(B * K * HWp),
        bytes_accessed=int(B * K * HWp * 4
                           + 2 * B * K * HWp * out_itemsize
                           + 2 * HWp * 4))

    gt, gf = pl.pallas_call(
        kernel,
        out_shape=(jax.ShapeDtypeStruct((B, K, HWp), out_dtype),
                   jax.ShapeDtypeStruct((B, K, HWp), out_dtype)),
        grid=grid,
        in_specs=[
            pl.BlockSpec((BB, K, HWp), lambda b: (b, 0, 0)),
            pl.BlockSpec((2, HWp), lambda b: (0, 0)),
        ],
        out_specs=(
            pl.BlockSpec((BB, K, HWp), lambda b: (b, 0, 0)),
            pl.BlockSpec((BB, K, HWp), lambda b: (b, 0, 0)),
        ),
        compiler_params=pltpu.CompilerParams(
            dimension_semantics=("parallel",),
            vmem_limit_bytes=32 * 1024 * 1024),
        cost_estimate=cost,
    )(y2, coords)

    gt = gt[:, :, :HW].reshape(B, K, H, W)
    gf = gf[:, :, :HW].reshape(B, K, H, W)
    return gt, gf


# ---------------------------------------------------------------------------
# Pure-numpy reference (mirrors the PyTorch forward exactly)
# ---------------------------------------------------------------------------
def reference_forward(heatmap_np, sigma=2.0):
    B, K, H, W = heatmap_np.shape
    flat = heatmap_np.reshape(B, K, -1)
    idx = flat.argmax(axis=-1)
    pred_h = idx // W
    pred_w = idx % W
    delta_h = np.arange(H, dtype=np.float32)[None, None, :] - pred_h[..., None]
    delta_w = np.arange(W, dtype=np.float32)[None, None, :] - pred_w[..., None]
    gauss = np.exp(-(delta_h[..., :, None] ** 2 + delta_w[..., None, :] ** 2)
                   / (2.0 * sigma * sigma)).astype(np.float32)
    gt = np.where(gauss > 0.01, gauss, 0.0).astype(np.float32)
    gf = np.clip(gt.sum(axis=1, keepdims=True) - gt, 0.0, 1.0).astype(np.float32)
    return gt, gf


if __name__ == "__main__":
    SIGMA = 2.0
    k1, k2 = jax.random.split(jax.random.PRNGKey(0))

    # Primary shape: already lane-dense (H*W = 256).
    hm1 = jax.random.uniform(k1, (2, 4, 16, 16), dtype=jnp.float32)
    gt1, gf1 = fast_pseudo_label_generator_2d(hm1, sigma=SIGMA)
    jax.block_until_ready((gt1, gf1))
    gt1_ref, gf1_ref = reference_forward(np.asarray(hm1), SIGMA)
    np.testing.assert_allclose(np.asarray(gt1), gt1_ref, atol=1e-5, rtol=0)
    np.testing.assert_allclose(np.asarray(gf1), gf1_ref, atol=1e-5, rtol=0)

    # Secondary shape exercising lane padding (H*W = 108 -> padded to 128) and
    # the non-power-of-two-width index decomposition.
    hm2 = jax.random.uniform(k2, (3, 5, 12, 9), dtype=jnp.float32)
    gt2, gf2 = fast_pseudo_label_generator_2d(hm2, sigma=SIGMA)
    jax.block_until_ready((gt2, gf2))
    gt2_ref, gf2_ref = reference_forward(np.asarray(hm2), SIGMA)
    np.testing.assert_allclose(np.asarray(gt2), gt2_ref, atol=1e-5, rtol=0)
    np.testing.assert_allclose(np.asarray(gf2), gf2_ref, atol=1e-5, rtol=0)

    print("KERNEL_OK")
</pallas_src>

<mosaic_0001>
module attributes {stable_mosaic.version = 11 : i64} {
  func.func @_fast_pseudo_label_kernel(%arg0: i32, %arg1: memref<1x4x256xf32, #tpu.memory_space<vmem>>, %arg2: memref<2x256xf32, #tpu.memory_space<vmem>>, %arg3: memref<1x4x256xf32, #tpu.memory_space<vmem>>, %arg4: memref<1x4x256xf32, #tpu.memory_space<vmem>>) attributes {dimension_semantics = [#tpu.dimension_semantics<parallel>], iteration_bounds = array<i64: 2>, scalar_prefetch = 0 : i64, scratch_operands = 0 : i64, tpu.core_type = #tpu.core_type<tc>, window_params = [{transform_indices = @transform_0, window_bounds = array<i64: 1, 4, 256>}, {pipeline_mode = #tpu.pipeline_mode<synchronous>, transform_indices = @transform_1, window_bounds = array<i64: 2, 256>}, {transform_indices = @transform_2, window_bounds = array<i64: 1, 4, 256>}, {transform_indices = @transform_3, window_bounds = array<i64: 1, 4, 256>}]} {
    %c0 = arith.constant 0 : index
    %c0_0 = arith.constant 0 : index
    %c0_1 = arith.constant 0 : index
    %0 = vector.load %arg1[%c0, %c0_0, %c0_1] : memref<1x4x256xf32, #tpu.memory_space<vmem>>, vector<1x4x256xf32>
    %cst = arith.constant dense<0xFF800000> : vector<1x4xf32>
    %1 = vector.multi_reduction <maximumf>, %0, %cst [2] : vector<1x4x256xf32> to vector<1x4xf32>
    %2 = vector.shape_cast %1 : vector<1x4xf32> to vector<1x4x1xf32>
    %3 = tpu.iota {dimensions = array<i32: 2>} : vector<1x4x256xi32>
    %4 = arith.sitofp %3 : vector<1x4x256xi32> to vector<1x4x256xf32>
    %5 = vector.broadcast %2 : vector<1x4x1xf32> to vector<1x4x256xf32>
    %6 = arith.cmpf oeq, %0, %5 : vector<1x4x256xf32>
    %cst_2 = arith.constant 2.560000e+02 : f32
    %7 = vector.broadcast %cst_2 : f32 to vector<1x4x256xf32>
    %8 = arith.select %6, %4, %7 : vector<1x4x256xi1>, vector<1x4x256xf32>
    %cst_3 = arith.constant dense<0x7F800000> : vector<1x4xf32>
    %9 = vector.multi_reduction <minimumf>, %8, %cst_3 [2] : vector<1x4x256xf32> to vector<1x4xf32>
    %10 = vector.shape_cast %9 : vector<1x4xf32> to vector<1x4x1xf32>
    %cst_4 = arith.constant 5.000000e-01 : f32
    %11 = vector.broadcast %cst_4 : f32 to vector<1x4x1xf32>
    %12 = arith.addf %10, %11 : vector<1x4x1xf32>
    %cst_5 = arith.constant 1.600000e+01 : f32
    %13 = vector.broadcast %cst_5 : f32 to vector<1x4x1xf32>
    %14 = arith.divf %12, %13 : vector<1x4x1xf32>
    %15 = math.floor %14 : vector<1x4x1xf32>
    %cst_6 = arith.constant 1.600000e+01 : f32
    %16 = vector.broadcast %cst_6 : f32 to vector<1x4x1xf32>
    %17 = arith.mulf %15, %16 : vector<1x4x1xf32>
    %18 = arith.subf %10, %17 : vector<1x4x1xf32>
    %cst_7 = arith.constant 1.600000e+01 : f32
    %19 = vector.broadcast %cst_7 : f32 to vector<1x4x1xf32>
    %20 = arith.cmpf oge, %18, %19 : vector<1x4x1xf32>
    %cst_8 = arith.constant 1.000000e+00 : f32
    %cst_9 = arith.constant 0.000000e+00 : f32
    %21 = vector.broadcast %cst_8 : f32 to vector<1x4x1xf32>
    %22 = vector.broadcast %cst_9 : f32 to vector<1x4x1xf32>
    %23 = arith.select %20, %21, %22 : vector<1x4x1xi1>, vector<1x4x1xf32>
    %24 = arith.addf %15, %23 : vector<1x4x1xf32>
    %cst_10 = arith.constant 0.000000e+00 : f32
    %25 = vector.broadcast %cst_10 : f32 to vector<1x4x1xf32>
    %26 = arith.cmpf olt, %18, %25 : vector<1x4x1xf32>
    %cst_11 = arith.constant 1.000000e+00 : f32
    %cst_12 = arith.constant 0.000000e+00 : f32
    %27 = vector.broadcast %cst_11 : f32 to vector<1x4x1xf32>
    %28 = vector.broadcast %cst_12 : f32 to vector<1x4x1xf32>
    %29 = arith.select %26, %27, %28 : vector<1x4x1xi1>, vector<1x4x1xf32>
    %30 = arith.subf %24, %29 : vector<1x4x1xf32>
    %cst_13 = arith.constant 1.600000e+01 : f32
    %31 = vector.broadcast %cst_13 : f32 to vector<1x4x1xf32>
    %32 = arith.mulf %30, %31 : vector<1x4x1xf32>
    %33 = arith.subf %10, %32 : vector<1x4x1xf32>
    %c0_14 = arith.constant 0 : index
    %c0_15 = arith.constant 0 : index
    %34 = vector.load %arg2[%c0_14, %c0_15] : memref<2x256xf32, #tpu.memory_space<vmem>>, vector<2x256xf32>
    %35 = vector.extract_strided_slice %34 {offsets = [0, 0], sizes = [1, 256], strides = [1, 1]} : vector<2x256xf32> to vector<1x256xf32>
    %36 = vector.shape_cast %35 : vector<1x256xf32> to vector<1x1x256xf32>
    %37 = vector.extract_strided_slice %34 {offsets = [1, 0], sizes = [1, 256], strides = [1, 1]} : vector<2x256xf32> to vector<1x256xf32>
    %38 = vector.shape_cast %37 : vector<1x256xf32> to vector<1x1x256xf32>
    %39 = vector.broadcast %36 : vector<1x1x256xf32> to vector<1x4x256xf32>
    %40 = vector.broadcast %30 : vector<1x4x1xf32> to vector<1x4x256xf32>
    %41 = arith.subf %39, %40 : vector<1x4x256xf32>
    %42 = vector.broadcast %38 : vector<1x1x256xf32> to vector<1x4x256xf32>
    %43 = vector.broadcast %33 : vector<1x4x1xf32> to vector<1x4x256xf32>
    %44 = arith.subf %42, %43 : vector<1x4x256xf32>
    %45 = arith.mulf %41, %41 : vector<1x4x256xf32>
    %46 = arith.mulf %44, %44 : vector<1x4x256xf32>
    %47 = arith.addf %45, %46 : vector<1x4x256xf32>
    %cst_16 = arith.constant 0.000000e+00 : f32
    %48 = vector.broadcast %cst_16 : f32 to vector<1x4x256xf32>
    %49 = arith.subf %48, %47 : vector<1x4x256xf32>
    %cst_17 = arith.constant 1.250000e-01 : f32
    %50 = vector.broadcast %cst_17 : f32 to vector<1x4x256xf32>
    %51 = arith.mulf %49, %50 : vector<1x4x256xf32>
    %52 = math.exp %51 : vector<1x4x256xf32>
    %cst_18 = arith.constant 0.00999999977 : f32
    %53 = vector.broadcast %cst_18 : f32 to vector<1x4x256xf32>
    %54 = arith.cmpf ogt, %52, %53 : vector<1x4x256xf32>
    %cst_19 = arith.constant 0.000000e+00 : f32
    %55 = vector.broadcast %cst_19 : f32 to vector<1x4x256xf32>
    %56 = arith.select %54, %52, %55 : vector<1x4x256xi1>, vector<1x4x256xf32>
    %cst_20 = arith.constant dense<0.000000e+00> : vector<1x256xf32>
    %57 = vector.multi_reduction <add>, %56, %cst_20 [1] : vector<1x4x256xf32> to vector<1x256xf32>
    %58 = vector.shape_cast %57 : vector<1x256xf32> to vector<1x1x256xf32>
    %59 = vector.broadcast %58 : vector<1x1x256xf32> to vector<1x4x256xf32>
    %60 = arith.subf %59, %56 : vector<1x4x256xf32>
    %cst_21 = arith.constant 0.000000e+00 : f32
    %cst_22 = arith.constant 1.000000e+00 : f32
    %61 = vector.broadcast %cst_21 : f32 to vector<1x4x256xf32>
    %62 = arith.maximumf %61, %60 : vector<1x4x256xf32>
    %63 = vector.broadcast %cst_22 : f32 to vector<1x4x256xf32>
    %64 = arith.minimumf %63, %62 : vector<1x4x256xf32>
    %c0_23 = arith.constant 0 : index
    %c0_24 = arith.constant 0 : index
    %c0_25 = arith.constant 0 : index
    %65 = vector.load %arg3[%c0_23, %c0_24, %c0_25] : memref<1x4x256xf32, #tpu.memory_space<vmem>>, vector<1x4x256xf32>
    tpu.vector_store %arg3[%c0_23, %c0_24, %c0_25], %56 {strides = array<i32>} : memref<1x4x256xf32, #tpu.memory_space<vmem>>, vector<1x4x256xf32>,
    %c0_26 = arith.constant 0 : index
    %c0_27 = arith.constant 0 : index
    %c0_28 = arith.constant 0 : index
    %66 = vector.load %arg4[%c0_26, %c0_27, %c0_28] : memref<1x4x256xf32, #tpu.memory_space<vmem>>, vector<1x4x256xf32>
    tpu.vector_store %arg4[%c0_26, %c0_27, %c0_28], %64 {strides = array<i32>} : memref<1x4x256xf32, #tpu.memory_space<vmem>>, vector<1x4x256xf32>,
    return
  }
  func.func @transform_0(%arg0: i32) -> (i32, i32, i32) {
    %c0_i32 = arith.constant 0 : i32
    %c0_i32_0 = arith.constant 0 : i32
    %c0_i32_1 = arith.constant 0 : i32
    return %arg0, %c0_i32, %c0_i32_0 : i32, i32, i32
  }
  func.func @transform_1(%arg0: i32) -> (i32, i32) {
    %c0_i32 = arith.constant 0 : i32
    %c0_i32_0 = arith.constant 0 : i32
    %c0_i32_1 = arith.constant 0 : i32
    return %c0_i32, %c0_i32_0 : i32, i32
  }
  func.func @transform_2(%arg0: i32) -> (i32, i32, i32) {
    %c0_i32 = arith.constant 0 : i32
    %c0_i32_0 = arith.constant 0 : i32
    %c0_i32_1 = arith.constant 0 : i32
    return %arg0, %c0_i32, %c0_i32_0 : i32, i32, i32
  }
  func.func @transform_3(%arg0: i32) -> (i32, i32, i32) {
    %c0_i32 = arith.constant 0 : i32
    %c0_i32_0 = arith.constant 0 : i32
    %c0_i32_1 = arith.constant 0 : i32
    return %arg0, %c0_i32, %c0_i32_0 : i32, i32, i32
  }
}

</mosaic_0001>

<bundles_post_ra>
// kernel: tpu_custom_call.1
= control target key start
LH: loop header
LB: loop body
LE: loop exit
PB: predicated region body
PF: predicated region fallthrough
CT: control target
= control target key end

     0   :  { %9 = vsyncpa [#allocation3], 0  ;;  %s950_s0 = inlined_call_operand.hbm [shape: f32[2,4,256], index: 0, kind: input, shape index: {}]   ;;  %s951_s1 = inlined_call_operand.hbm [shape: f32[2,256], index: 1, kind: input, shape index: {}]   ;;  %s952_s2 = inlined_call_operand.hbm [shape: f32[2,4,256], index: 2, kind: output, shape index: {0}]   ;;  %s953_s3 = inlined_call_operand.hbm [shape: f32[2,4,256], index: 3, kind: output, shape index: {1}]  }
   0x1   :  { %11 = vsyncpa [#allocation3 + $0x1], 0 }
   0x2   :  { %12 = vsyncpa [#allocation6], 0 }
   0x3   :  { %13 = vsyncpa [#allocation4], 0 }
   0x4   :  { %15 = vsyncpa [#allocation4 + $0x1], 0 }
   0x5   :  { %16 = vsyncpa [#allocation9], 0 }
   0x6   :  { %18 = vsyncpa [#allocation9 + $0x1], 0  ;;  %s777_s12 = smov 0   ;;  %s779_s13 = smov 0  }
   0x7   :  { %s781_s14 = smov 0   ;;  %s783_s15 = smov 0  }
   0x8 LB: > { %s798_s16 = sadd.s32 4294967295, %s751_s15   ;;  %s495_s17 = sadd.s32 4294967294, %s751_s15   ;;  %s751_s15 = sphi %s783_s15, %s963_s15   ;;  %s747_s14 = sphi %s781_s14, %s962_s14   ;;  %s743_s13 = sphi %s779_s13, %s961_s13   ;;  %s739_s12 = sphi %s777_s12, %s960_s12  }
   0x9   : > { %p44_p0 = scmp.ne.s32.totalorder %s743_s13, %s739_s12  ;;  %p45_p1 = scmp.eq.s32.totalorder %s798_s16, 0 }
   0xa   : > { %p89_p2 = scmp.eq.s32.totalorder %s798_s16, 1  ;;  %p95_p3 = scmp.eq.s32.totalorder %s495_s17, 1 }
   0xb   : > { %p807_p4 = por %p45_p1, %p44_p0  ;;  %p496_p5 = scmp.ge.s32.totalorder %s751_s15, 1 }
   0xc   : > { %p812_p6 = por %p95_p3, %p44_p0  ;;  %p128_p7 = scmp.lt.s32.totalorder %s751_s15, 3 }
   0xd   : > { %s140_s22 = sshll.u32 %s951_s1, 4  ;;  %s753_s24 = smov [#allocation5]   ;;  %s141_s22 = int_to_ptr.hbm [resolvable:$true] %s140_s22 }
   0xe   : > { %p820_p8 = pnand %p496_p5, %p128_p7  ;;  %s142_s25 = sshll.u32 %s753_s24, 4  ;;  %s143_s25 = int_to_ptr.vmem [resolvable:$true] %s142_s25 }
   0xf   : > { %s830_s26 = sadd.s32 1, %s751_s15   ;;  %s31_s27 = sadd.s32 1, %s747_s14 }
  0x10   : > { %p528_p10 = pneg %p820_p8  ;;  %s28_s28 = ssub.s32 %s751_s15, %s830_s26 }
  0x11   : > { %p29_p12 = scmp.eq.s32.totalorder %s28_s28, 0  ;;  %p38_p13 = scmp.ne.s32.totalorder %s747_s14, %s743_s13 }
  0x12   : > { %p529_p11 = pnand %p528_p10, %p45_p1  ;;  %p39_p0 = scmp.eq.s32.totalorder %s751_s15, 0 }
  0x13   : > { %s839_s29 = scalar_select %p29_p12, %s747_s14, %s31_s27  }
  0x14   : > { %531 = dma.hbm_to_vmem [thread:$0]  (!%p529_p11), %s141_s22, 64, %s143_s25, [#allocation6]  }
  0x15   : > { %p843_p3 = por %p89_p2, %p38_p13  ;;  %p544_p5 = scmp.lt.s32.totalorder %s751_s15, 2 }
  0x16   : > { %s153_s4 = sand.u32 1, %s747_s14   ;;  %s515_s5 = sshll.u32 %s751_s15, 3 }
  0x17   : > { %p40_p7 = por %p39_p0, %p38_p13  ;;  %s499_s6 = sshll.u32 %s153_s4, 3 }
  0x18   : > { %s162_s9 = scalar_lea.hbm %s950_s0, %s515_s5  ;;  %s157_s11 = scalar_lea.vmem [#allocation2], %s499_s6 }
  0x19   : > { %s164_s10 = sshll.u32 %s162_s9, 4  ;;  %s166_s17 = sshll.u32 %s157_s11, 4  ;;  %s165_s10 = int_to_ptr.hbm [resolvable:$true] %s164_s10  ;;  %s167_s17 = int_to_ptr.vmem [resolvable:$true] %s166_s17 }
  0x1a   : > { %p853_p10 = pnand %p544_p5, %p40_p7  ;;  %s154_s21 = scalar_lea.sflag [#allocation3], %s153_s4 }
  0x1b   : > { %s619_s22 = sshra.s32 %s165_s10, 4  ;;  %s626_s28 = scalar_lea.hbm %s950_s0, 16  ;;  %s620_s22 = int_to_ptr.hbm [resolvable:$true] %s619_s22 }
  0x1c   : > { %s621_s24 = scalar_lea.hbm %s620_s22, 8  ;;  %p623_p11 = pneg %p853_p10 }
  0x1d   : > { %p622_p2 = scmp.ne.s32.totalorder %s620_s22, %s621_s24  ;;  %p627_p0 = scmp.lt.s32.totalorder %s620_s22, %s950_s0 }
  0x1e   : > { %p628_p5 = scmp.lt.s32.totalorder %s626_s28, %s621_s24 }
  0x1f   : > { %p624_p12 = pnand %p623_p11, %p622_p2 }
  0x20   : > { %p629_p7 = por %p628_p5, %p627_p0 }
  0x21   : > { %p625_p13 = pneg %p624_p12 }
  0x23   : > { %p630_p9 = pnand %p629_p7, %p625_p13 }
  0x25   : > { %633 = shalt.err (!%p630_p9)
}
  0x26   : > { %535 = dma.hbm_to_vmem [thread:$0]  (!%p853_p10), %s165_s10, 128, %s167_s17, %s154_s21  }
  0x27   : > { %175 = sbr.rel (%p820_p8) target bundleno = 374 (0x176), region = 28  ;;  %s870_s4 = sand.u32 (!%p820_p8), 1, %s743_s13  }
  0x28   : > { %s873_s7 = sshll.u32 (!%p820_p8), %s870_s4, 3  ;;  %s178_s8 = scalar_lea.sflag (!%p820_p8), [#allocation3], %s870_s4 }
  0x29   : > { %s181_s9 = scalar_lea.vmem (!%p820_p8), [#allocation2], %s873_s7 }
  0x2c   : > { %722 = dma.done.wait (%p807_p4), %s178_s8, 128  }
  0x2d   : > { %724 = vsyncadd (%p807_p4), %s178_s8, 4294967168 }
  0x2e   : > { %726 = dma.done.wait (%p45_p1), [#allocation6], 64  }
  0x2f   : > { %728 = vsyncadd (%p45_p1), [#allocation6], 4294967232  ;;  %v215_v0 = vld [vmem:[%s181_s9] sm:$0xff]  ;;  %vm222_vm0 = vcmask 1043456   ;;  %v228_v6 = vlaneseq  ;;  %v754_v10 = vmov 839922192  }
  0x30   : > { %217 = vst [vmem:[#allocation1] ss:$2 sm:$0xff] %v215_v0  ;;  %v235_v11 = vunpack.c.l.s4 %v754_v10  ;;  %v755_v24 = vmov 16.0   ;;  %v277_v36 = vld [vmem:[#allocation5] sm:$0xf]  ;;  %v756_v40 = vmov 0.0  }
  0x31   : > { %v229_v7 = vand.u32 127, %v228_v6  ;;  %583 = vrcp.f32 %v755_v24  ;;  %v279_v38 = vperm.slane %v277_v36, 0  ;;  %v280_v39 = vperm.slane %v277_v36, 2  ;;  %s516_s18 = sshll.u32 %s798_s16, 3  ;;  %s207_s17 = scalar_lea.vmem [#allocation7], %s873_s7 }
  0x32   : > { %v236_v13 = vunpack.c.0.s8 %v235_v11  ;;  %v287_v42 = vperm.slane %v277_v36, 1  ;;  %v288_v43 = vperm.slane %v277_v36, 3  ;;  %s362_s11 = scalar_lea.hbm %s952_s2, %s516_s18  ;;  %s897_s20 = sshll.u32 %s207_s17, 4  ;;  %s365_s20 = int_to_ptr.vmem [resolvable:$true] %s897_s20 }
  0x33   : > { %v230_v8 = vadd.s32 128, %v229_v7  ;;  %v231_v12 = vcvt.s32.f32 %v229_v7  ;;  %v283_v46 = vperm.slane %v279_v38, 0  ;;  %v284_v47 = vperm.slane %v280_v39, 0  ;;  %s366_s21 = sshll.u32 %s362_s11, 4  ;;  %s346_s22 = scalar_lea.sflag [#allocation4], %s870_s4  ;;  %s367_s21 = int_to_ptr.hbm [resolvable:$true] %s366_s21 }
  0x34   : > { %v291_v49 = vperm.slane %v287_v42, 1  ;;  %v292_v50 = vperm.slane %v288_v43, 1  ;;  %s663_s24 = sshra.s32 %s367_s21, 4  ;;  %s669_s5 = scalar_lea.hbm %s952_s2, 16  ;;  %s664_s24 = int_to_ptr.hbm [resolvable:$true] %s663_s24 }
  0x35   : > { %v232_v9 = vcvt.s32.f32 %v230_v8  ;;  %s665_s25 = scalar_lea.hbm %s664_s24, 8  ;;  %p670_p9 = scmp.lt.s32.totalorder %s664_s24, %s952_s2 }
  0x36   : > { %p666_p1 = scmp.ne.s32.totalorder %s664_s24, %s665_s25  ;;  %p671_p10 = scmp.lt.s32.totalorder %s669_s5, %s665_s25 }
  0x37   : > { %v218_v1 = vld.sshfl [vmem:[#allocation1] sm:$0xff pattern:$0x75316420]  ;;  %v219_v2 = vld.sshfl [vmem:[#allocation1 + $0x8] sm:$0xff pattern:$0x75316420]  ;;  %v584_v25 = vpop.eup %583 }
  0x38   : > { %v223_v3 = vsel %vm222_vm0, %v218_v1, -inf  ;;  %v224_v4 = vsel %vm222_vm0, %v219_v2, -inf  ;;  %v242_v14 = vrot.slane %v232_v9, 4  ;;  %v259_v26 = vmul.f32 16.0, %v584_v25  ;;  %p667_p4 = pnand %p666_p1, %p843_p3  ;;  %p672_p2 = por %p671_p10, %p670_p9 }
  0x39   : > { %v225_v5 = vmax.f32 %v223_v3, %v224_v4  ;;  %vm263_vm2 = vweird.f32 %v584_v25 }
  0x3a   : > { %v243_v16 = vsel %vm222_vm0, %v231_v12, %v242_v14  ;;  %v260_v27 = vsub.f32 1.0, %v259_v26  ;;  %p668_p8 = pneg %p667_p4 }
  0x3b   : > { %226 = vmax.xlane.f32.xlu0 %v225_v5 }
  0x3c   : > { %v261_v28 = vmul.f32 %v584_v25, %v260_v27  ;;  %p673_p11 = pnand %p672_p2, %p668_p8 }
  0x3e   : > { %v262_v29 = vadd.f32 %v584_v25, %v261_v28 }
  0x40   : > { %v264_v30 = vsel %vm263_vm2, %v584_v25, %v262_v29 }
  0xae   : > { %v227_v15 = vpop.xlane.xlu0 %226 }
  0xaf   : > { %v237_v17 = vperm.slane %v227_v15, %v236_v13 }
  0xb1   : > { %vm239_vm1 = vcmp.eq.f32.partialorder %v215_v0, %v237_v17 }
  0xb2   : > { %v245_v18 = vsel %vm239_vm1, %v243_v16, 256.0 }
  0xb3   : > { %247 = vst [vmem:[#allocation1] ss:$2 sm:$0xff] %v245_v18 }
  0xba   : > { %v248_v19 = vld.sshfl [vmem:[#allocation1] sm:$0xff pattern:$0x75316420]  ;;  %v249_v20 = vld.sshfl [vmem:[#allocation1 + $0x8] sm:$0xff pattern:$0x75316420] }
  0xbb   : > { %v252_v21 = vsel %vm222_vm0, %v248_v19, inf  ;;  %v253_v22 = vsel %vm222_vm0, %v249_v20, inf }
  0xbc   : > { %v254_v23 = vmin.f32 %v252_v21, %v253_v22 }
  0xbe   : > { %255 = vmin.xlane.f32.xlu0 %v254_v23 }
 0x131   : > { %v256_v31 = vpop.xlane.xlu0 %255 }
 0x132   : > { %v257_v32 = vadd.f32 0.5, %v256_v31 }
 0x134   : > { %v265_v33 = vmul.f32 %v264_v30, %v257_v32 }
 0x136   : > { %v266_v34 = vfloor.f32 %v265_v33 }
 0x138   : > { %v267_v35 = vmul.f32 16.0, %v266_v34 }
 0x13a   : > { %v268_v37 = vsub.f32 %v256_v31, %v267_v35 }
 0x13c   : > { %vm269_vm3 = vcmp.ge.f32.partialorder %v268_v37, 16.0  ;;  %vm272_vm4 = vcmp.lt.f32.partialorder %v268_v37, 0.0 }
 0x13d   : > { %v270_v41 = vsel %vm269_vm3, 1.0, %v756_v40  ;;  %v273_v45 = vsel %vm272_vm4, 1.0, %v756_v40 }
 0x13e   : > { %v271_v44 = vadd.f32 %v270_v41, %v266_v34 }
 0x140   : > { %v274_v48 = vsub.f32 %v271_v44, %v273_v45 }
 0x142   : > { %v275_v51 = vmul.f32 16.0, %v274_v48  ;;  %v285_v53 = vsub.f32 %v283_v46, %v274_v48  ;;  %v286_v54 = vsub.f32 %v284_v47, %v274_v48 }
 0x144   : > { %v276_v52 = vsub.f32 %v256_v31, %v275_v51  ;;  %v295_v57 = vmul.f32 %v285_v53, %v285_v53  ;;  %v296_v58 = vmul.f32 %v286_v54, %v286_v54 }
 0x146   : > { %v293_v55 = vsub.f32 %v291_v49, %v276_v52  ;;  %v294_v56 = vsub.f32 %v292_v50, %v276_v52 }
 0x148   : > { %v297_v59 = vmul.f32 %v293_v55, %v293_v55  ;;  %v298_v60 = vmul.f32 %v294_v56, %v294_v56 }
 0x14a   : > { %v299_v61 = vadd.f32 %v297_v59, %v295_v57  ;;  %v300_v62 = vadd.f32 %v298_v60, %v296_v58 }
 0x14c   : > { %v301_v63 = vsub.f32 0.0, %v299_v61  ;;  %v302_v0 = vsub.f32 0.0, %v300_v62 }
 0x14e   : > { %v303_v1 = vmul.f32 0.125, %v301_v63  ;;  %v304_v2 = vmul.f32 0.125, %v302_v0 }
 0x150   : > { %v305_v3 = vmul.f32 1.442695, %v303_v1  ;;  %v307_v4 = vmul.f32 1.442695, %v304_v2 }
 0x152   : > { %585 = vpow2.f32 %v305_v3 }
 0x153   : > { %587 = vpow2.f32 %v307_v4 }
 0x158   : > { %v586_v5 = vpop.eup %585 }
 0x159   : > { %v588_v6 = vpop.eup %587  ;;  %vm309_vm5 = vcmp.gt.f32.partialorder %v586_v5, 0.01 }
 0x15a   : > { %vm310_vm6 = vcmp.gt.f32.partialorder %v588_v6, 0.01  ;;  %v311_v7 = vsel %vm309_vm5, %v586_v5, 0.0 }
 0x15b   : > { %v312_v8 = vsel %vm310_vm6, %v588_v6, 0.0  ;;  %v313_v9 = vsel %vm222_vm0, %v311_v7, 0.0 }
 0x15c   : > { %v314_v10 = vrot.slane %v313_v9, 4  ;;  %v320_v11 = vsel %vm222_vm0, %v312_v8, 0.0  ;;  %v335_v12 = vrot.slane %v312_v8, 4 }
 0x15d   : > { %v321_v13 = vrot.slane %v320_v11, 4 }
 0x15e   : > { %v315_v14 = vadd.f32 %v314_v10, %v313_v9  ;;  %v336_v15 = vsel %vm222_vm0, %v311_v7, %v335_v12 }
 0x15f   : > { %v322_v16 = vadd.f32 %v321_v13, %v320_v11  ;;  %338 = vst [vmem:[%s207_s17] sm:$0xff] %v336_v15 }
 0x160   : > { %v316_v17 = vrot.slane %v315_v14, 2 }
 0x161   : > { %676 = shalt.err (!%p673_p11)
}
 0x162   : > { %524 = dma.vmem_to_hbm [thread:$0]  (%p843_p3), %s365_s20, 128, %s367_s21, %s346_s22   ;;  %v323_v18 = vrot.slane %v322_v16, 2  ;;  %v317_v19 = vadd.f32 %v316_v17, %v315_v14 }
 0x163   : > { %s377_s10 = scalar_lea.hbm %s953_s3, %s516_s18  ;;  %s214_s11 = scalar_lea.vmem [#allocation8], %s873_s7 }
 0x164   : > { %v324_v20 = vadd.f32 %v323_v18, %v322_v16  ;;  %v318_v21 = vrot.slane %v317_v19, 1  ;;  %s379_s17 = sshll.u32 %s214_s11, 4  ;;  %s381_s20 = sshll.u32 %s377_s10, 4  ;;  %s380_s17 = int_to_ptr.vmem [resolvable:$true] %s379_s17  ;;  %s382_s20 = int_to_ptr.hbm [resolvable:$true] %s381_s20 }
 0x165   : > { %s351_s21 = scalar_lea.sflag [#allocation9], %s870_s4  ;;  %s691_s16 = sshra.s32 %s382_s20, 4  ;;  %s692_s16 = int_to_ptr.hbm [resolvable:$true] %s691_s16 }
 0x166   : > { %v325_v22 = vrot.slane %v324_v20, 1  ;;  %v319_v23 = vadd.f32 %v318_v21, %v317_v19  ;;  %s693_s22 = scalar_lea.hbm %s692_s16, 8  ;;  %s697_s7 = scalar_lea.hbm %s953_s3, 16 }
 0x167   : > { %p694_p12 = scmp.ne.s32.totalorder %s692_s16, %s693_s22  ;;  %p698_p5 = scmp.lt.s32.totalorder %s692_s16, %s953_s3 }
 0x168   : > { %v326_v24 = vadd.f32 %v325_v22, %v324_v20  ;;  %v327_v25 = vsub.f32 %v319_v23, %v311_v7  ;;  %p699_p7 = scmp.lt.s32.totalorder %s697_s7, %s693_s22 }
 0x169   : > { %p695_p13 = pnand %p694_p12, %p843_p3 }
 0x16a   : > { %v328_v26 = vsub.f32 %v326_v24, %v312_v8  ;;  %v329_v27 = vmax.f32 %v327_v25, 0.0  ;;  %p700_p1 = por %p699_p7, %p698_p5 }
 0x16b   : > { %p696_p0 = pneg %p695_p13 }
 0x16c   : > { %v330_v28 = vmax.f32 %v328_v26, 0.0  ;;  %v331_v30 = vmin.f32 %v329_v27, 1.0 }
 0x16d   : > { %p701_p4 = pnand %p700_p1, %p696_p0 }
 0x16e   : > { %v332_v29 = vmin.f32 %v330_v28, 1.0 }
 0x170   : > { %v341_v31 = vrot.slane %v332_v29, 4 }
 0x172   : > { %v342_v32 = vsel %vm222_vm0, %v331_v30, %v341_v31 }
 0x173   : > { %344 = vst [vmem:[%s214_s11] sm:$0xff] %v342_v32 }
 0x174   : > { %704 = shalt.err (!%p701_p4)
}
 0x175   : > { %525 = dma.vmem_to_hbm [thread:$0]  (%p843_p3), %s380_s17, 128, %s382_s20, %s351_s21  }
 0x176 PF: > { %s393_s4 = sand.u32 1, %s739_s12   ;;  %p959_p8 = scmp.ge.s32.totalorder %s751_s15, 2 }
 0x177   : > { %s394_s28 = scalar_lea.sflag [#allocation4], %s393_s4 }
 0x178   : > { %p537_p9 = pnand %p959_p8, %p812_p6 }
 0x17a   : > { %p538_p10 = pneg %p537_p9 }
 0x17c   : > { %730 = dma.done.wait (%p538_p10), %s394_s28, 128  }
 0x17d   : > { %732 = vsyncadd (%p538_p10), %s394_s28, 4294967168  ;;  %s404_s5 = scalar_lea.sflag [#allocation9], %s393_s4 }
 0x17e   : > { %734 = dma.done.wait (%p538_p10), %s404_s5, 128  }
 0x17f   : > { %736 = vsyncadd (%p538_p10), %s404_s5, 4294967168  ;;  %p21_p3 = scmp.ge.s32.totalorder %s830_s26, 4   ;;  %s960_s12 = smov %s743_s13 }
 0x180   : > { %s961_s13 = smov %s747_s14  ;;  %s962_s14 = smov %s839_s29 }
 0x181   : > { %s963_s15 = smov %s830_s26  ;;  %23 = sbr.rel (!%p21_p3) target bundleno = 8 (0x8), region = 94 }
 0x186   :  { %410 = vsyncpa [#allocation3], 1 }
 0x187   :  { %412 = vsyncpa [#allocation3 + $0x1], 1 }
 0x188   :  { %413 = vsyncpa [#allocation6], 1 }
 0x189   :  { %414 = vsyncpa [#allocation4], 1 }
 0x18a   :  { %416 = vsyncpa [#allocation4 + $0x1], 1 }
 0x18b   :  { %417 = vsyncpa [#allocation9], 1 }
 0x18c   :  { %419 = vsyncpa [#allocation9 + $0x1], 1 }

</bundles_post_ra>
